<compile_context>
chip_gen: v5e
topology: v5e:2x2
jax: 0.10.0
libtpu: 0.0.40
codegen_flags: <defaults>
</compile_context>

<pallas_src>
import jax
import jax.numpy as jnp
from jax.experimental import pallas as pl
from jax.experimental.pallas import tpu as pltpu


# ---------------------------------------------------------------- Pallas kernel

def _fused_classifier_kernel(x_ref, w1_ref, scale_ref, shift_ref,
                             w2_ref, b2_ref, wc_ref, bc_ref, o_ref):
    # Conv1d(1,C,7,s=6) as Toeplitz matmul + folded BatchNorm(eval)+bias + ReLU
    x = x_ref[...]                                                 # (tb, L_in)
    h1 = jnp.dot(x, w1_ref[...], preferred_element_type=jnp.float32)
    h1 = jnp.maximum(h1 * scale_ref[...] + shift_ref[...], 0.0)    # (tb, L1*C)

    # Conv1d(C,2C,5,s=4) as Toeplitz matmul + bias + Tanh   (Dropout1d = id in eval)
    h2 = jnp.dot(h1, w2_ref[...], preferred_element_type=jnp.float32)
    h2 = jnp.tanh(h2 + b2_ref[...])                                # (tb, L2*2C)

    # lc Linear (rows pre-permuted to match PyTorch channel-major flatten)
    logits = jnp.dot(h2, wc_ref[...], preferred_element_type=jnp.float32)
    logits = logits + bc_ref[...]                                  # (tb, n_classes)

    # numerically-stable log_softmax along dim=1
    m = jnp.max(logits, axis=1, keepdims=True)
    z = logits - m
    lse = jnp.log(jnp.sum(jnp.exp(z), axis=1, keepdims=True))
    o_ref[...] = z - lse


# ---------------------------------------------------------------- param prep (JAX glue)

def _toeplitz_conv1_weight(w1, L_in, L1, C):
    # w1: (C, 1, 7) -> (L_in, L1*C) with [l, t*C + c] = w1[c, 0, l - 6*t]
    w1 = w1.reshape(C, 7).T                                        # (7, C)
    l = jnp.arange(L_in)[:, None]
    t = jnp.arange(L1)[None, :]
    k = l - 6 * t                                                  # (L_in, L1)
    valid = (k >= 0) & (k < 7)
    w = jnp.where(valid[:, :, None], w1[jnp.clip(k, 0, 6)], 0.0)   # (L_in, L1, C)
    return w.reshape(L_in, L1 * C)


def _toeplitz_conv2_weight(w2, L1, L2, C):
    # w2: (2C, C, 5) -> (L1*C, L2*2C) with [t1*C+ci, t2*2C+co] = w2[co, ci, t1 - 4*t2]
    twoC = w2.shape[0]
    w2 = jnp.transpose(w2, (2, 1, 0))                              # (5, C, 2C)
    t1 = jnp.arange(L1)[:, None]
    t2 = jnp.arange(L2)[None, :]
    k = t1 - 4 * t2                                                # (L1, L2)
    valid = (k >= 0) & (k < 5)
    w = jnp.where(valid[:, :, None, None], w2[jnp.clip(k, 0, 4)], 0.0)  # (L1, L2, C, 2C)
    w = jnp.transpose(w, (0, 2, 1, 3))                             # (L1, C, L2, 2C)
    return w.reshape(L1 * C, L2 * twoC)


@jax.jit
def classifier_forward(x, params):
    """x: (bs, 1, in_features) float32 (NCW, like the PyTorch module)."""
    bs, _, L_in = x.shape
    C = params["w1"].shape[0]
    twoC = params["w2"].shape[0]
    n_classes = params["wc"].shape[0]
    L1 = (L_in - 7) // 6 + 1
    L2 = (L1 - 5) // 4 + 1
    eps = 1e-5

    # ---- weight / BN folding (tiny, hoisted+fused by XLA under jit) ----
    w1t = _toeplitz_conv1_weight(params["w1"], L_in, L1, C)        # (L_in, L1*C)
    scale_c = params["bn_gamma"] / jnp.sqrt(params["bn_var"] + eps)
    shift_c = params["bn_beta"] - params["bn_mean"] * scale_c + params["b1"] * scale_c
    scale = jnp.tile(scale_c, L1).reshape(1, L1 * C)               # index = t*C + c
    shift = jnp.tile(shift_c, L1).reshape(1, L1 * C)

    w2t = _toeplitz_conv2_weight(params["w2"], L1, L2, C)          # (L1*C, L2*2C)
    b2 = jnp.tile(params["b2"], L2).reshape(1, L2 * twoC)          # index = t2*2C + co

    # PyTorch flattens (bs, 2C, L2) channel-major: feature = co*L2 + t2.
    # Our h2 rows are ordered t2*2C + co, so permute the Linear weight rows to match.
    wc = params["wc"].reshape(n_classes, twoC, L2)
    wc = jnp.transpose(wc, (2, 1, 0)).reshape(L2 * twoC, n_classes)
    bc = params["bc"].reshape(1, n_classes)

    x2d = x.reshape(bs, L_in)                                      # channel dim == 1

    # ---- fused kernel: batch-tiled grid, weights broadcast across tiles ----
    tb = bs if bs <= 256 else 256                                  # multiple of 8 when tiling
    grid = (pl.cdiv(bs, tb),)
    bcast = lambda i: (0, 0)

    out = pl.pallas_call(
        _fused_classifier_kernel,
        out_shape=jax.ShapeDtypeStruct((bs, n_classes), jnp.float32),
        grid=grid,
        in_specs=[
            pl.BlockSpec((tb, L_in), lambda i: (i, 0)),
            pl.BlockSpec((L_in, L1 * C), bcast),
            pl.BlockSpec((1, L1 * C), bcast),
            pl.BlockSpec((1, L1 * C), bcast),
            pl.BlockSpec((L1 * C, L2 * twoC), bcast),
            pl.BlockSpec((1, L2 * twoC), bcast),
            pl.BlockSpec((L2 * twoC, n_classes), bcast),
            pl.BlockSpec((1, n_classes), bcast),
        ],
        out_specs=pl.BlockSpec((tb, n_classes), lambda i: (i, 0)),
        compiler_params=pltpu.CompilerParams(dimension_semantics=("parallel",)),
    )(x2d, w1t, scale, shift, w2t, b2, wc, bc)
    return out


# ---------------------------------------------------------------- pure-JAX reference

def _reference_forward(x, params):
    bs = x.shape[0]
    C = params["w1"].shape[0]
    eps = 1e-5

    def im2col(a, k, s):
        L = a.shape[-1]
        Lo = (L - k) // s + 1
        idx = s * jnp.arange(Lo)[:, None] + jnp.arange(k)[None, :]
        return jnp.transpose(a[:, :, idx], (0, 2, 1, 3)), Lo

    p1, L1 = im2col(x, 7, 6)
    y1 = p1.reshape(bs * L1, 7) @ params["w1"].reshape(C, 7).T + params["b1"]
    sc = params["bn_gamma"] / jnp.sqrt(params["bn_var"] + eps)
    y1 = (y1 - params["bn_mean"]) * sc + params["bn_beta"]
    h1 = jnp.maximum(y1, 0.0).reshape(bs, L1, C).transpose(0, 2, 1)
    p2, L2 = im2col(h1, 5, 4)
    y2 = p2.reshape(bs * L2, C * 5) @ params["w2"].reshape(2 * C, C * 5).T + params["b2"]
    h2 = jnp.tanh(y2).reshape(bs, L2, 2 * C).transpose(0, 2, 1)
    logits = h2.reshape(bs, -1) @ params["wc"].T + params["bc"]
    return jax.nn.log_softmax(logits, axis=1)


# ---------------------------------------------------------------- main

if __name__ == "__main__":
    key = jax.random.PRNGKey(0)

    # Small shapes consistent with the module: complexity=6, out_classes=3.
    bs, in_features = 2, 200
    C, n_classes = 6, 3
    L1 = (in_features - 7) // 6 + 1        # = 33
    L2 = (L1 - 5) // 4 + 1                 # = 8  (latent_size)

    ks = jax.random.split(key, 7)
    params = {
        # Conv1d(1, C, 7) weight (C, 1, 7), bias (C,)
        "w1": 0.1 * jax.random.normal(ks[0], (C, 1, 7), jnp.float32),
        "b1": 0.1 * jax.random.normal(ks[1], (C,), jnp.float32),
        # BatchNorm1d(C) eval-mode parameters / running stats
        "bn_gamma": jnp.ones((C,), jnp.float32),
        "bn_beta": jnp.zeros((C,), jnp.float32),
        "bn_mean": jnp.zeros((C,), jnp.float32),
        "bn_var": jnp.ones((C,), jnp.float32),
        # Conv1d(C, 2C, 5) weight (2C, C, 5), bias (2C,)
        "w2": 0.1 * jax.random.normal(ks[2], (2 * C, C, 5), jnp.float32),
        "b2": 0.1 * jax.random.normal(ks[3], (2 * C,), jnp.float32),
        # lc = Linear(2C*latent_size, out_classes): weight (3, 2C*L2), bias (3,)
        "wc": 0.1 * jax.random.normal(ks[4], (n_classes, 2 * C * L2), jnp.float32),
        "bc": 0.1 * jax.random.normal(ks[5], (n_classes,), jnp.float32),
    }

    x = jax.random.normal(ks[6], (bs, 1, in_features), jnp.float32)

    out = classifier_forward(x, params)
    jax.block_until_ready(out)
    assert out.shape == (bs, n_classes)
    assert bool(jnp.all(jnp.isfinite(out)))

    ref = _reference_forward(x, params)
    assert bool(jnp.allclose(out, ref, atol=2e-3, rtol=2e-3))

    print("KERNEL_OK")
</pallas_src>

<mosaic_0001>
module attributes {stable_mosaic.version = 11 : i64} {
  func.func @_fused_classifier_kernel(%arg0: i32, %arg1: memref<2x200xf32, #tpu.memory_space<vmem>>, %arg2: memref<200x198xf32, #tpu.memory_space<vmem>>, %arg3: memref<1x198xf32, #tpu.memory_space<vmem>>, %arg4: memref<1x198xf32, #tpu.memory_space<vmem>>, %arg5: memref<198x96xf32, #tpu.memory_space<vmem>>, %arg6: memref<1x96xf32, #tpu.memory_space<vmem>>, %arg7: memref<96x3xf32, #tpu.memory_space<vmem>>, %arg8: memref<1x3xf32, #tpu.memory_space<vmem>>, %arg9: memref<2x3xf32, #tpu.memory_space<vmem>>) attributes {dimension_semantics = [#tpu.dimension_semantics<parallel>], iteration_bounds = array<i64: 1>, scalar_prefetch = 0 : i64, scratch_operands = 0 : i64, tpu.core_type = #tpu.core_type<tc>, window_params = [{transform_indices = @transform_0, window_bounds = array<i64: 2, 200>}, {pipeline_mode = #tpu.pipeline_mode<synchronous>, transform_indices = @transform_1, window_bounds = array<i64: 200, 198>}, {pipeline_mode = #tpu.pipeline_mode<synchronous>, transform_indices = @transform_2, window_bounds = array<i64: 1, 198>}, {pipeline_mode = #tpu.pipeline_mode<synchronous>, transform_indices = @transform_3, window_bounds = array<i64: 1, 198>}, {pipeline_mode = #tpu.pipeline_mode<synchronous>, transform_indices = @transform_4, window_bounds = array<i64: 198, 96>}, {pipeline_mode = #tpu.pipeline_mode<synchronous>, transform_indices = @transform_5, window_bounds = array<i64: 1, 96>}, {pipeline_mode = #tpu.pipeline_mode<synchronous>, transform_indices = @transform_6, window_bounds = array<i64: 96, 3>}, {pipeline_mode = #tpu.pipeline_mode<synchronous>, transform_indices = @transform_7, window_bounds = array<i64: 1, 3>}, {transform_indices = @transform_8, window_bounds = array<i64: 2, 3>}]} {
    %c0 = arith.constant 0 : index
    %c0_0 = arith.constant 0 : index
    %0 = vector.load %arg1[%c0, %c0_0] : memref<2x200xf32, #tpu.memory_space<vmem>>, vector<2x200xf32>
    %c0_1 = arith.constant 0 : index
    %c0_2 = arith.constant 0 : index
    %1 = vector.load %arg2[%c0_1, %c0_2] : memref<200x198xf32, #tpu.memory_space<vmem>>, vector<200x198xf32>
    %cst = arith.constant dense<0.000000e+00> : vector<2x198xf32>
    %2 = tpu.matmul %0, %1, %cst {dimension_numbers = #tpu.dot_dimension_numbers<[1], [0], [0], [1], [0, 0, 1, 1], [], []>} : vector<2x200xf32>, vector<200x198xf32>, vector<2x198xf32> -> vector<2x198xf32>
    %c0_3 = arith.constant 0 : index
    %c0_4 = arith.constant 0 : index
    %3 = vector.load %arg3[%c0_3, %c0_4] : memref<1x198xf32, #tpu.memory_space<vmem>>, vector<1x198xf32>
    %4 = vector.broadcast %3 : vector<1x198xf32> to vector<2x198xf32>
    %5 = arith.mulf %2, %4 : vector<2x198xf32>
    %c0_5 = arith.constant 0 : index
    %c0_6 = arith.constant 0 : index
    %6 = vector.load %arg4[%c0_5, %c0_6] : memref<1x198xf32, #tpu.memory_space<vmem>>, vector<1x198xf32>
    %7 = vector.broadcast %6 : vector<1x198xf32> to vector<2x198xf32>
    %8 = arith.addf %5, %7 : vector<2x198xf32>
    %cst_7 = arith.constant 0.000000e+00 : f32
    %9 = vector.broadcast %cst_7 : f32 to vector<2x198xf32>
    %10 = arith.maximumf %8, %9 : vector<2x198xf32>
    %c0_8 = arith.constant 0 : index
    %c0_9 = arith.constant 0 : index
    %11 = vector.load %arg5[%c0_8, %c0_9] : memref<198x96xf32, #tpu.memory_space<vmem>>, vector<198x96xf32>
    %cst_10 = arith.constant dense<0.000000e+00> : vector<2x96xf32>
    %12 = tpu.matmul %10, %11, %cst_10 {dimension_numbers = #tpu.dot_dimension_numbers<[1], [0], [0], [1], [0, 0, 1, 1], [], []>} : vector<2x198xf32>, vector<198x96xf32>, vector<2x96xf32> -> vector<2x96xf32>
    %c0_11 = arith.constant 0 : index
    %c0_12 = arith.constant 0 : index
    %13 = vector.load %arg6[%c0_11, %c0_12] : memref<1x96xf32, #tpu.memory_space<vmem>>, vector<1x96xf32>
    %14 = vector.broadcast %13 : vector<1x96xf32> to vector<2x96xf32>
    %15 = arith.addf %12, %14 : vector<2x96xf32>
    %16 = math.tanh %15 : vector<2x96xf32>
    %c0_13 = arith.constant 0 : index
    %c0_14 = arith.constant 0 : index
    %17 = vector.load %arg7[%c0_13, %c0_14] : memref<96x3xf32, #tpu.memory_space<vmem>>, vector<96x3xf32>
    %cst_15 = arith.constant dense<0.000000e+00> : vector<2x3xf32>
    %18 = tpu.matmul %16, %17, %cst_15 {dimension_numbers = #tpu.dot_dimension_numbers<[1], [0], [0], [1], [0, 0, 1, 1], [], []>} : vector<2x96xf32>, vector<96x3xf32>, vector<2x3xf32> -> vector<2x3xf32>
    %c0_16 = arith.constant 0 : index
    %c0_17 = arith.constant 0 : index
    %19 = vector.load %arg8[%c0_16, %c0_17] : memref<1x3xf32, #tpu.memory_space<vmem>>, vector<1x3xf32>
    %20 = vector.broadcast %19 : vector<1x3xf32> to vector<2x3xf32>
    %21 = arith.addf %18, %20 : vector<2x3xf32>
    %cst_18 = arith.constant dense<0xFF800000> : vector<2xf32>
    %22 = vector.multi_reduction <maximumf>, %21, %cst_18 [1] : vector<2x3xf32> to vector<2xf32>
    %23 = vector.shape_cast %22 : vector<2xf32> to vector<2x1xf32>
    %24 = vector.broadcast %23 : vector<2x1xf32> to vector<2x3xf32>
    %25 = arith.subf %21, %24 : vector<2x3xf32>
    %26 = math.exp %25 : vector<2x3xf32>
    %cst_19 = arith.constant dense<0.000000e+00> : vector<2xf32>
    %27 = vector.multi_reduction <add>, %26, %cst_19 [1] : vector<2x3xf32> to vector<2xf32>
    %28 = vector.shape_cast %27 : vector<2xf32> to vector<2x1xf32>
    %29 = math.log %28 : vector<2x1xf32>
    %30 = vector.broadcast %29 : vector<2x1xf32> to vector<2x3xf32>
    %31 = arith.subf %25, %30 : vector<2x3xf32>
    %c0_20 = arith.constant 0 : index
    %c0_21 = arith.constant 0 : index
    %32 = vector.load %arg9[%c0_20, %c0_21] : memref<2x3xf32, #tpu.memory_space<vmem>>, vector<2x3xf32>
    tpu.vector_store %arg9[%c0_20, %c0_21], %31 {strides = array<i32>} : memref<2x3xf32, #tpu.memory_space<vmem>>, vector<2x3xf32>,
    return
  }
  func.func @transform_0(%arg0: i32) -> (i32, i32) {
    %c0_i32 = arith.constant 0 : i32
    %c0_i32_0 = arith.constant 0 : i32
    return %arg0, %c0_i32 : i32, i32
  }
  func.func @transform_1(%arg0: i32) -> (i32, i32) {
    %c0_i32 = arith.constant 0 : i32
    %c0_i32_0 = arith.constant 0 : i32
    %c0_i32_1 = arith.constant 0 : i32
    return %c0_i32, %c0_i32_0 : i32, i32
  }
  func.func @transform_2(%arg0: i32) -> (i32, i32) {
    %c0_i32 = arith.constant 0 : i32
    %c0_i32_0 = arith.constant 0 : i32
    %c0_i32_1 = arith.constant 0 : i32
    return %c0_i32, %c0_i32_0 : i32, i32
  }
  func.func @transform_3(%arg0: i32) -> (i32, i32) {
    %c0_i32 = arith.constant 0 : i32
    %c0_i32_0 = arith.constant 0 : i32
    %c0_i32_1 = arith.constant 0 : i32
    return %c0_i32, %c0_i32_0 : i32, i32
  }
  func.func @transform_4(%arg0: i32) -> (i32, i32) {
    %c0_i32 = arith.constant 0 : i32
    %c0_i32_0 = arith.constant 0 : i32
    %c0_i32_1 = arith.constant 0 : i32
    return %c0_i32, %c0_i32_0 : i32, i32
  }
  func.func @transform_5(%arg0: i32) -> (i32, i32) {
    %c0_i32 = arith.constant 0 : i32
    %c0_i32_0 = arith.constant 0 : i32
    %c0_i32_1 = arith.constant 0 : i32
    return %c0_i32, %c0_i32_0 : i32, i32
  }
  func.func @transform_6(%arg0: i32) -> (i32, i32) {
    %c0_i32 = arith.constant 0 : i32
    %c0_i32_0 = arith.constant 0 : i32
    %c0_i32_1 = arith.constant 0 : i32
    return %c0_i32, %c0_i32_0 : i32, i32
  }
  func.func @transform_7(%arg0: i32) -> (i32, i32) {
    %c0_i32 = arith.constant 0 : i32
    %c0_i32_0 = arith.constant 0 : i32
    %c0_i32_1 = arith.constant 0 : i32
    return %c0_i32, %c0_i32_0 : i32, i32
  }
  func.func @transform_8(%arg0: i32) -> (i32, i32) {
    %c0_i32 = arith.constant 0 : i32
    %c0_i32_0 = arith.constant 0 : i32
    return %arg0, %c0_i32 : i32, i32
  }
}

</mosaic_0001>

<bundles_post_ra>
// kernel: tile.18
= control target key start
LH: loop header
LB: loop body
LE: loop exit
PB: predicated region body
PF: predicated region fallthrough
CT: control target
= control target key end

     0   :  { %s46_s0 = inlined_call_operand.vmem [shape: f32[6], index: 0, kind: input, shape index: {}]   ;;  %s47_s1 = inlined_call_operand.vmem [shape: f32[33,6], index: 1, kind: output, shape index: {}]  }
   0x1   :  { %v4_v0 = vld [vmem:[%s46_s0] ss:$0 sm:$0xff] }
   0x2   :  { %5 = vst [vmem:[%s47_s1] sm:$0xff] %v4_v0 }
   0x3   :  { %14 = vst [vmem:[%s47_s1 + $0x8] sm:$0xff] %v4_v0 }
   0x4   :  { %15 = vst [vmem:[%s47_s1 + $0x10] sm:$0xff] %v4_v0 }
   0x5   :  { %16 = vst [vmem:[%s47_s1 + $0x18] sm:$0xff] %v4_v0 }
   0x6   :  { %17 = vst [vmem:[%s47_s1 + $0x20] sm:$0xff] %v4_v0 }

// kernel: tile.19
= control target key start
LH: loop header
LB: loop body
LE: loop exit
PB: predicated region body
PF: predicated region fallthrough
CT: control target
= control target key end

     0   :  { %vm9_vm0 = vcmask 15360   ;;  %s293_s10 = smov 114   ;;  %s294_s13 = smov 126   ;;  %vm3_vm1 = vcmask 48128   ;;  %vm13_vm2 = vcmask 31744   ;;  %vm16_vm3 = vcmask 1048560   ;;  %s443_s0 = inlined_call_operand.vmem [shape: f32[33,6], index: 0, kind: input, shape index: {}]   ;;  %s444_s1 = inlined_call_operand.vmem [shape: f32[1,198], index: 1, kind: output, shape index: {}]  }
   0x1   :  { %v230_v0 = vld [vmem:[%s443_s0 + $0x13] sm:$0x1]   ;;  %v227_v1 = vld [vmem:[%s443_s0 + $0x15] sm:$0x1]   ;;  %v232_v4 = vld [vmem:[%s443_s0 + $0x11] sm:$0x1]  }
   0x2   :  { %26 = vrot.lane.b32.xlu1 %v230_v0, %s293_s10  ;;  %v228_v2 = vld [vmem:[%s443_s0 + $0x15] sm:$0x1]   ;;  %s295_s16 = smov 102   ;;  %v231_v5 = vld [vmem:[%s443_s0 + $0x12] sm:$0x1]   ;;  %s296_s21 = smov 108  }
   0x3   :  { %v10_v3 = vsel %vm9_vm0, %v228_v2, %v227_v1  ;;  %38 = vrot.lane.b32.xlu2 %v232_v4, %s295_s16  ;;  %v229_v6 = vld [vmem:[%s443_s0 + $0x14] sm:$0x1]   ;;  %v233_v7 = vld [vmem:[%s443_s0 + $0x10] sm:$0x1]   ;;  %s297_s24 = smov 120   ;;  %s298_s25 = smov 96  }
   0x4   :  { %11 = vrot.lane.b32.xlu0 %v10_v3, %s294_s13  ;;  %v235_v8 = vld [vmem:[%s443_s0 + $0xe] sm:$0x1]   ;;  %v234_v9 = vld [vmem:[%s443_s0 + $0xf] sm:$0x1]   ;;  %s299_s30 = smov 84   ;;  %s300_s4 = smov 90  }
   0x5   :  { %v236_v10 = vld [vmem:[%s443_s0 + $0xd] sm:$0x1]   ;;  %s301_s5 = smov 78   ;;  %v238_v11 = vld [vmem:[%s443_s0 + $0xb] sm:$0x1]   ;;  %s302_s10 = smov 66  }
   0x6   :  { %v237_v12 = vld [vmem:[%s443_s0 + $0xc] sm:$0x1]   ;;  %v239_v13 = vld [vmem:[%s443_s0 + $0x20] sm:$0x1]   ;;  %s303_s13 = smov 72   ;;  %s304_s14 = smov 64  }
   0x7   :  { %v241_v14 = vld [vmem:[%s443_s0 + $0x1f] sm:$0x1]   ;;  %v240_v15 = vld [vmem:[%s443_s0 + $0xa] sm:$0x1]   ;;  %s305_s19 = smov 58   ;;  %s306_s22 = smov 60  }
   0x8   :  { %v242_v16 = vld [vmem:[%s443_s0 + $0x9] sm:$0x1]   ;;  %s307_s23 = smov 54   ;;  %v244_v17 = vld [vmem:[%s443_s0 + $0x8] sm:$0x1]   ;;  %s308_s28 = smov 48  }
   0x9   :  { %v243_v18 = vld [vmem:[%s443_s0 + $0x1e] sm:$0x1]   ;;  %v245_v19 = vld [vmem:[%s443_s0 + $0x1d] sm:$0x1]   ;;  %s309_s2 = smov 52   ;;  %s310_s3 = smov 46  }
   0xa   :  { %32 = vrot.lane.b32.xlu1 %v231_v5, %s296_s21  ;;  %v247_v20 = vld [vmem:[%s443_s0 + $0x1c] sm:$0x1]   ;;  %v246_v21 = vld [vmem:[%s443_s0 + $0x7] sm:$0x1]   ;;  %s311_s8 = smov 40   ;;  %s312_s11 = smov 42  }
   0xb   :  { %44 = vrot.lane.b32.xlu2 %v233_v7, %s298_s25  ;;  %v248_v22 = vld [vmem:[%s443_s0 + $0x6] sm:$0x1]   ;;  %s313_s12 = smov 36   ;;  %v250_v23 = vld [vmem:[%s443_s0 + $0x5] sm:$0x1]   ;;  %s314_s17 = smov 30  }
   0xc   :  { %20 = vrot.lane.b32.xlu0 %v229_v6, %s297_s24  ;;  %v249_v24 = vld [vmem:[%s443_s0 + $0x1b] sm:$0x1]   ;;  %v251_v25 = vld [vmem:[%s443_s0 + $0x1a] sm:$0x1]   ;;  %s315_s20 = smov 34   ;;  %s316_s21 = smov 28  }
   0xd   :  { %v253_v26 = vld [vmem:[%s443_s0 + $0x19] sm:$0x1]   ;;  %v252_v27 = vld [vmem:[%s443_s0 + $0x4] sm:$0x1]   ;;  %s317_s26 = smov 22   ;;  %s318_s29 = smov 24  }
   0xe   :  { %v254_v28 = vld [vmem:[%s443_s0 + $0x3] sm:$0x1]   ;;  %v256_v29 = vld [vmem:[%s443_s0 + $0x2] sm:$0x1]   ;;  %v255_v30 = vld [vmem:[%s443_s0 + $0x18] sm:$0x1]  }
   0xf   :  { %s320_s6 = smov 12   ;;  %v257_v31 = vld [vmem:[%s443_s0 + $0x17] sm:$0x1]   ;;  %s321_s9 = smov 16   ;;  %v259_v32 = vld [vmem:[%s443_s0 + $0x16] sm:$0x1]  }
  0x10   :  { %v258_v33 = vld [vmem:[%s443_s0 + $0x1] sm:$0x1]   ;;  %s323_s15 = smov 4   ;;  %s324_s16 = smov 6   ;;  %v2_v34 = vld [vmem:[%s443_s0] sm:$0x1]  }
  0x11   :  { %4 = vst.msk [vmem:[#allocation0] sm:$0x1] %vm3_vm1, %v2_v34   ;;  %vm82_vm4 = vcmask 572928   ;;  %vm22_vm5 = vcmask 1032128   ;;  %vm28_vm6 = vcmask 982928   ;;  %vm34_vm7 = vcmask 933728  }
  0x12   :  { %56 = vrot.lane.b32.xlu1 %v235_v8, %s299_s30  ;;  %s319_s30 = smov 18   ;;  %vm40_vm8 = vcmask 884528   ;;  %vm46_vm9 = vcmask 835328   ;;  %vm52_vm10 = vcmask 786128   ;;  %vm58_vm11 = vcmask 736928  }
  0x13   :  { %62 = vrot.lane.b32.xlu2 %v236_v10, %s301_s5  ;;  %vm64_vm12 = vcmask 687728   ;;  %vm70_vm13 = vcmask 638528   ;;  %vm76_vm14 = vcmask 589328   ;;  %vm95_vm15 = vcmask 523728  }
  0x14   :  { %50 = vrot.lane.b32.xlu0 %v234_v9, %s300_s4  ;;  %vm89_vm0 = vcmask 540128   ;;  %vm102_vm1 = vcmask 490928  }
  0x1a   :  { %74 = vrot.lane.b32.xlu1 %v238_v11, %s302_s10  ;;  %s322_s10 = smov 10  }
  0x1b   :  { %80 = vrot.lane.b32.xlu2 %v239_v13, %s304_s14 }
  0x1c   :  { %68 = vrot.lane.b32.xlu0 %v237_v12, %s303_s13 }
  0x22   :  { %93 = vrot.lane.b32.xlu1 %v241_v14, %s305_s19 }
  0x23   :  { %100 = vrot.lane.b32.xlu2 %v242_v16, %s307_s23 }
  0x24   :  { %87 = vrot.lane.b32.xlu0 %v240_v15, %s306_s22 }
  0x2a   :  { %113 = vrot.lane.b32.xlu1 %v244_v17, %s308_s28 }
  0x2b   :  { %119 = vrot.lane.b32.xlu2 %v245_v19, %s310_s3 }
  0x2c   :  { %106 = vrot.lane.b32.xlu0 %v243_v18, %s309_s2 }
  0x32   :  { %132 = vrot.lane.b32.xlu1 %v247_v20, %s311_s8 }
  0x33   :  { %139 = vrot.lane.b32.xlu2 %v248_v22, %s313_s12 }
  0x34   :  { %126 = vrot.lane.b32.xlu0 %v246_v21, %s312_s11 }
  0x3a   :  { %152 = vrot.lane.b32.xlu1 %v250_v23, %s314_s17 }
  0x3b   :  { %158 = vrot.lane.b32.xlu2 %v251_v25, %s316_s21 }
  0x3c   :  { %145 = vrot.lane.b32.xlu0 %v249_v24, %s315_s20 }
  0x42   :  { %171 = vrot.lane.b32.xlu1 %v253_v26, %s317_s26 }
  0x43   :  { %178 = vrot.lane.b32.xlu2 %v254_v28, %s319_s30 }
  0x44   :  { %165 = vrot.lane.b32.xlu0 %v252_v27, %s318_s29 }
  0x4a   :  { %191 = vrot.lane.b32.xlu1 %v256_v29, %s320_s6 }
  0x4b   :  { %197 = vrot.lane.b32.xlu2 %v257_v31, %s322_s10 }
  0x4c   :  { %184 = vrot.lane.b32.xlu0 %v255_v30, %s321_s9 }
  0x52   :  { %210 = vrot.lane.b32.xlu1 %v259_v32, %s323_s15 }
  0x54   :  { %204 = vrot.lane.b32.xlu0 %v258_v33, %s324_s16 }
  0x5d   :  { %v39_v35 = vpop.permute.xlu2 %38  }
  0x65   :  { %v45_v36 = vpop.permute.xlu2 %44  }
  0x6d   :  { %v63_v37 = vpop.permute.xlu2 %62  }
  0x74   :  { %v27_v38 = vpop.permute.xlu1 %26  }
  0x75   :  { %v81_v40 = vpop.permute.xlu2 %80  }
  0x76   :  { %v12_v39 = vpop.permute.xlu0 %11  }
  0x77   :  { %15 = vst.msk [vmem:[#allocation0 + $0x8] sm:$0x1] %vm13_vm2, %v12_v39   ;;  %vm115_vm2 = vcmask 441728  }
  0x78   :  { %17 = vst.msk [vmem:[#allocation0] sm:$0x1] %vm16_vm3, %v12_v39   ;;  %vm108_vm3 = vcmask 474528  }
  0x79   :  { %84 = vst.msk [vmem:[#allocation0 + $0x8] sm:$0x1] %vm82_vm4, %v81_v40   ;;  %vm121_vm4 = vcmask 425328  }
  0x7c   :  { %v33_v41 = vpop.permute.xlu1 %32  }
  0x7d   :  { %v101_v43 = vpop.permute.xlu2 %100  }
  0x7e   :  { %v21_v42 = vpop.permute.xlu0 %20  }
  0x7f   :  { %23 = vst.msk [vmem:[#allocation0] sm:$0x1] %vm22_vm5, %v21_v42   ;;  %vm134_vm5 = vcmask 376128  }
  0x80   :  { %29 = vst.msk [vmem:[#allocation0] sm:$0x1] %vm28_vm6, %v27_v38   ;;  %vm128_vm6 = vcmask 392528  }
  0x81   :  { %35 = vst.msk [vmem:[#allocation0] sm:$0x1] %vm34_vm7, %v33_v41   ;;  %vm141_vm7 = vcmask 343328  }
  0x82   :  { %41 = vst.msk [vmem:[#allocation0] sm:$0x1] %vm40_vm8, %v39_v35   ;;  %vm154_vm8 = vcmask 294128  }
  0x83   :  { %47 = vst.msk [vmem:[#allocation0] sm:$0x1] %vm46_vm9, %v45_v36   ;;  %vm147_vm9 = vcmask 326928  }
  0x84   :  { %v57_v44 = vpop.permute.xlu1 %56  }
  0x85   :  { %v120_v46 = vpop.permute.xlu2 %119  }
  0x86   :  { %v51_v45 = vpop.permute.xlu0 %50  }
  0x87   :  { %53 = vst.msk [vmem:[#allocation0] sm:$0x1] %vm52_vm10, %v51_v45   ;;  %vm160_vm10 = vcmask 277728  }
  0x88   :  { %59 = vst.msk [vmem:[#allocation0] sm:$0x1] %vm58_vm11, %v57_v44   ;;  %vm173_vm11 = vcmask 228528  }
  0x89   :  { %65 = vst.msk [vmem:[#allocation0] sm:$0x1] %vm64_vm12, %v63_v37   ;;  %vm167_vm12 = vcmask 244928  }
  0x8c   :  { %v75_v47 = vpop.permute.xlu1 %74  }
  0x8d   :  { %v140_v49 = vpop.permute.xlu2 %139  }
  0x8e   :  { %v69_v48 = vpop.permute.xlu0 %68  }
  0x8f   :  { %71 = vst.msk [vmem:[#allocation0] sm:$0x1] %vm70_vm13, %v69_v48   ;;  %vm180_vm13 = vcmask 195728  }
  0x90   :  { %77 = vst.msk [vmem:[#allocation0] sm:$0x1] %vm76_vm14, %v75_v47   ;;  %vm193_vm14 = vcmask 146528  }
  0x94   :  { %v94_v50 = vpop.permute.xlu1 %93  }
  0x95   :  { %97 = vst.msk [vmem:[#allocation0 + $0x8] sm:$0x1] %vm95_vm15, %v94_v50   ;;  %v159_v52 = vpop.permute.xlu2 %158   ;;  %vm186_vm15 = vcmask 179328  }
  0x96   :  { %v88_v51 = vpop.permute.xlu0 %87  }
  0x97   :  { %90 = vst.msk [vmem:[#allocation0] sm:$0x1] %vm89_vm0, %v88_v51   ;;  %vm199_vm0 = vcmask 130128  }
  0x98   :  { %103 = vst.msk [vmem:[#allocation0] sm:$0x1] %vm102_vm1, %v101_v43   ;;  %vm212_vm1 = vcmask 80928  }
  0x9c   :  { %v114_v53 = vpop.permute.xlu1 %113  }
  0x9d   :  { %116 = vst.msk [vmem:[#allocation0] sm:$0x1] %vm115_vm2, %v114_v53   ;;  %v179_v55 = vpop.permute.xlu2 %178   ;;  %vm206_vm2 = vcmask 97328  }
  0x9e   :  { %v107_v54 = vpop.permute.xlu0 %106  }
  0x9f   :  { %110 = vst.msk [vmem:[#allocation0 + $0x8] sm:$0x1] %vm108_vm3, %v107_v54  }
  0xa0   :  { %123 = vst.msk [vmem:[#allocation0 + $0x8] sm:$0x1] %vm121_vm4, %v120_v46  }
  0xa4   :  { %v133_v56 = vpop.permute.xlu1 %132  }
  0xa5   :  { %136 = vst.msk [vmem:[#allocation0 + $0x8] sm:$0x1] %vm134_vm5, %v133_v56   ;;  %v198_v58 = vpop.permute.xlu2 %197  }
  0xa6   :  { %v127_v57 = vpop.permute.xlu0 %126  }
  0xa7   :  { %129 = vst.msk [vmem:[#allocation0] sm:$0x1] %vm128_vm6, %v127_v57  }
  0xa8   :  { %142 = vst.msk [vmem:[#allocation0] sm:$0x1] %vm141_vm7, %v140_v49  }
  0xac   :  { %v153_v59 = vpop.permute.xlu1 %152  }
  0xad   :  { %155 = vst.msk [vmem:[#allocation0] sm:$0x1] %vm154_vm8, %v153_v59  }
  0xae   :  { %v146_v60 = vpop.permute.xlu0 %145  }
  0xaf   :  { %149 = vst.msk [vmem:[#allocation0 + $0x8] sm:$0x1] %vm147_vm9, %v146_v60  }
  0xb0   :  { %162 = vst.msk [vmem:[#allocation0 + $0x8] sm:$0x1] %vm160_vm10, %v159_v52  }
  0xb4   :  { %v172_v61 = vpop.permute.xlu1 %171  }
  0xb5   :  { %175 = vst.msk [vmem:[#allocation0 + $0x8] sm:$0x1] %vm173_vm11, %v172_v61  }
  0xb6   :  { %v166_v62 = vpop.permute.xlu0 %165  }
  0xb7   :  { %168 = vst.msk [vmem:[#allocation0] sm:$0x1] %vm167_vm12, %v166_v62  }
  0xb8   :  { %181 = vst.msk [vmem:[#allocation0] sm:$0x1] %vm180_vm13, %v179_v55  }
  0xbc   :  { %v192_v63 = vpop.permute.xlu1 %191  }
  0xbd   :  { %194 = vst.msk [vmem:[#allocation0] sm:$0x1] %vm193_vm14, %v192_v63  }
  0xbe   :  { %v185_v0 = vpop.permute.xlu0 %184  }
  0xbf   :  { %188 = vst.msk [vmem:[#allocation0 + $0x8] sm:$0x1] %vm186_vm15, %v185_v0  }
  0xc0   :  { %201 = vst.msk [vmem:[#allocation0 + $0x8] sm:$0x1] %vm199_vm0, %v198_v58  }
  0xc4   :  { %v211_v1 = vpop.permute.xlu1 %210  }
  0xc5   :  { %214 = vst.msk [vmem:[#allocation0 + $0x8] sm:$0x1] %vm212_vm1, %v211_v1  }
  0xc6   :  { %v205_v2 = vpop.permute.xlu0 %204  }
  0xc7   :  { %207 = vst.msk [vmem:[#allocation0] sm:$0x1] %vm206_vm2, %v205_v2  }
  0xcc   :  { %v222_v3 = vld [vmem:[#allocation0 + $0x8] sm:$0x1] }
  0xcd   :  { %260 = vst [vmem:[%s444_s1 + $0x1] sm:$0x1] %v222_v3 }
  0xce   :  { %v217_v4 = vld [vmem:[#allocation0] sm:$0x1] }
  0xcf   :  { %220 = vst [vmem:[%s444_s1] sm:$0x1] %v217_v4 }

// kernel: tile.28
= control target key start
LH: loop header
LB: loop body
LE: loop exit
PB: predicated region body
PF: predicated region fallthrough
CT: control target
= control target key end

     0   :  { %s22_s0 = inlined_call_operand.vmem [shape: f32[12], index: 0, kind: input, shape index: {}]   ;;  %s23_s1 = inlined_call_operand.vmem [shape: f32[8,12], index: 1, kind: output, shape index: {}]  }
   0x1   :  { %v4_v0 = vld [vmem:[%s22_s0] ss:$0 sm:$0xff] }
   0x2   :  { %5 = vst [vmem:[%s23_s1] sm:$0xff] %v4_v0 }

// kernel: tile.29
= control target key start
LH: loop header
LB: loop body
LE: loop exit
PB: predicated region body
PF: predicated region fallthrough
CT: control target
= control target key end

     0   :  { %s67_s10 = smov 84   ;;  %s68_s11 = smov 60   ;;  %vm3_vm0 = vcmask 97280   ;;  %vm9_vm1 = vcmask 786080   ;;  %vm15_vm2 = vcmask 687680   ;;  %vm21_vm3 = vcmask 589280   ;;  %s111_s0 = inlined_call_operand.vmem [shape: f32[8,12], index: 0, kind: input, shape index: {}]   ;;  %s112_s1 = inlined_call_operand.vmem [shape: f32[1,96], index: 1, kind: output, shape index: {}]  }
   0x1   :  { %v53_v0 = vld [vmem:[%s111_s0 + $0x7] sm:$0x1]   ;;  %v55_v1 = vld [vmem:[%s111_s0 + $0x5] sm:$0x1]   ;;  %v57_v2 = vld [vmem:[%s111_s0 + $0x3] sm:$0x1]  }
   0x2   :  { %7 = vrot.lane.b32.xlu0 %v53_v0, %s67_s10  ;;  %19 = vrot.lane.b32.xlu1 %v55_v1, %s68_s11  ;;  %s69_s14 = smov 36   ;;  %v54_v3 = vld [vmem:[%s111_s0 + $0x6] sm:$0x1]   ;;  %v56_v4 = vld [vmem:[%s111_s0 + $0x4] sm:$0x1]   ;;  %s70_s21 = smov 72  }
   0x3   :  { %31 = vrot.lane.b32.xlu2 %v57_v2, %s69_s14  ;;  %v58_v5 = vld [vmem:[%s111_s0 + $0x2] sm:$0x1]   ;;  %s71_s22 = smov 48   ;;  %s72_s23 = smov 24   ;;  %v59_v6 = vld [vmem:[%s111_s0 + $0x1] sm:$0x1]  }
   0x4   :  { %s73_s26 = smov 12   ;;  %v2_v7 = vld [vmem:[%s111_s0] sm:$0x1]   ;;  %vm27_vm4 = vcmask 490880   ;;  %vm33_vm5 = vcmask 392480   ;;  %vm39_vm6 = vcmask 294080  }
   0x5   :  { %4 = vst.msk [vmem:[#allocation0] sm:$0x1] %vm3_vm0, %v2_v7   ;;  %vm45_vm7 = vcmask 195680  }
   0xa   :  { %13 = vrot.lane.b32.xlu0 %v54_v3, %s70_s21  ;;  %25 = vrot.lane.b32.xlu1 %v56_v4, %s71_s22 }
   0xb   :  { %37 = vrot.lane.b32.xlu2 %v58_v5, %s72_s23 }
  0x12   :  { %43 = vrot.lane.b32.xlu0 %v59_v6, %s73_s26 }
  0x5d   :  { %v32_v8 = vpop.permute.xlu2 %31  }
  0x65   :  { %v38_v9 = vpop.permute.xlu2 %37  }
  0x74   :  { %v8_v10 = vpop.permute.xlu0 %7   ;;  %v20_v11 = vpop.permute.xlu1 %19  }
  0x75   :  { %10 = vst.msk [vmem:[#allocation0] sm:$0x1] %vm9_vm1, %v8_v10  }
  0x7c   :  { %v14_v12 = vpop.permute.xlu0 %13   ;;  %v26_v13 = vpop.permute.xlu1 %25  }
  0x7d   :  { %16 = vst.msk [vmem:[#allocation0] sm:$0x1] %vm15_vm2, %v14_v12  }
  0x7e   :  { %22 = vst.msk [vmem:[#allocation0] sm:$0x1] %vm21_vm3, %v20_v11  }
  0x7f   :  { %28 = vst.msk [vmem:[#allocation0] sm:$0x1] %vm27_vm4, %v26_v13  }
  0x80   :  { %34 = vst.msk [vmem:[#allocation0] sm:$0x1] %vm33_vm5, %v32_v8  }
  0x81   :  { %40 = vst.msk [vmem:[#allocation0] sm:$0x1] %vm39_vm6, %v38_v9  }
  0x84   :  { %v44_v14 = vpop.permute.xlu0 %43  }
  0x85   :  { %46 = vst.msk [vmem:[#allocation0] sm:$0x1] %vm45_vm7, %v44_v14  }
  0x8c   :  { %v49_v15 = vld [vmem:[#allocation0] sm:$0x1] }
  0x8d   :  { %52 = vst [vmem:[%s112_s1] sm:$0x1] %v49_v15 }

// kernel: classifier_forward.1
= control target key start
LH: loop header
LB: loop body
LE: loop exit
PB: predicated region body
PF: predicated region fallthrough
CT: control target
= control target key end

     0   :  { %vm86_vm0 = vcmask 588800   ;;  %vm220_vm1 = vcmask 1045504   ;;  %s706_s0 = inlined_call_operand.vmem [shape: f32[2,200], index: 0, kind: input, shape index: {}]   ;;  %s707_s1 = inlined_call_operand.vmem [shape: f32[200,198], index: 1, kind: input, shape index: {}]   ;;  %s708_s2 = inlined_call_operand.vmem [shape: f32[1,198], index: 2, kind: input, shape index: {}]   ;;  %s709_s3 = inlined_call_operand.vmem [shape: f32[1,198], index: 3, kind: input, shape index: {}]   ;;  %s710_s4 = inlined_call_operand.vmem [shape: f32[198,96], index: 4, kind: input, shape index: {}]   ;;  %s711_s5 = inlined_call_operand.vmem [shape: f32[1,96], index: 5, kind: input, shape index: {}]   ;;  %s712_s6 = inlined_call_operand.vmem [shape: f32[96,3], index: 6, kind: input, shape index: {}]   ;;  %s713_s7 = inlined_call_operand.vmem [shape: f32[1,3], index: 7, kind: input, shape index: {}]   ;;  %s714_s8 = inlined_call_operand.hbm [shape: f32[2,3], index: 8, kind: output, shape index: {}]  }
   0x1   :  { %v62_v0 = vld [vmem:[%s707_s1 + $0xf8] sm:$0xff]  ;;  %v60_v1 = vld [vmem:[%s707_s1 + $0xe8] sm:$0xff]  ;;  %v61_v2 = vld [vmem:[%s707_s1 + $0xf0] sm:$0xff] }
   0x2   :  { %129 = vmatpush.msra.mxu2 %v62_v0  ;;  %v58_v3 = vld [vmem:[%s707_s1 + $0xd8] sm:$0xff]  ;;  %89 = vmatpush.msra.mxu0 %v61_v2  ;;  %v59_v4 = vld [vmem:[%s707_s1 + $0xe0] sm:$0xff]  ;;  %v57_v5 = vld [vmem:[%s707_s1 + $0xd0] sm:$0xff] }
   0x3   :  { %v80_v6 = vld [vmem:[%s707_s1 + $0x188] sm:$0xff]  ;;  %v78_v8 = vld [vmem:[%s707_s1 + $0x178] sm:$0xff]  ;;  %v55_v9 = vld [vmem:[%s707_s1 + $0xc0] sm:$0xff] }
   0x4   :  { %130 = vmatpush.msra.mxu2 %v60_v1  ;;  %v56_v7 = vld [vmem:[%s707_s1 + $0xc8] sm:$0xff]  ;;  %90 = vmatpush.msra.mxu0 %v59_v4  ;;  %v54_v11 = vld [vmem:[%s707_s1 + $0xb8] sm:$0xff]  ;;  %v53_v12 = vld [vmem:[%s707_s1 + $0xb0] sm:$0xff] }
   0x5   :  { %156 = vmatpush.msra.mxu3 %v80_v6  ;;  %v76_v10 = vld [vmem:[%s707_s1 + $0x168] sm:$0xff]  ;;  %v74_v13 = vld [vmem:[%s707_s1 + $0x158] sm:$0xff]  ;;  %v79_v15 = vld [vmem:[%s707_s1 + $0x180] sm:$0xff] }
   0x6   :  { %131 = vmatpush.msra.mxu2 %v58_v3  ;;  %91 = vmatpush.msra.mxu0 %v57_v5  ;;  %v52_v14 = vld [vmem:[%s707_s1 + $0xa8] sm:$0xff]  ;;  %v51_v16 = vld [vmem:[%s707_s1 + $0xa0] sm:$0xff]  ;;  %v77_v18 = vld [vmem:[%s707_s1 + $0x170] sm:$0xff] }
   0x7   :  { %157 = vmatpush.msra.mxu3 %v78_v8  ;;  %v72_v17 = vld [vmem:[%s707_s1 + $0x148] sm:$0xff]  ;;  %116 = vmatpush.msra.mxu1 %v79_v15  ;;  %v50_v19 = vld [vmem:[%s707_s1 + $0x98] sm:$0xff]  ;;  %v49_v20 = vld [vmem:[%s707_s1 + $0x90] sm:$0xff] }
   0x8   :  { %132 = vmatpush.msra.mxu2 %v56_v7  ;;  %92 = vmatpush.msra.mxu0 %v55_v9  ;;  %v70_v21 = vld [vmem:[%s707_s1 + $0x138] sm:$0xff]  ;;  %v75_v22 = vld [vmem:[%s707_s1 + $0x160] sm:$0xff]  ;;  %v48_v23 = vld [vmem:[%s707_s1 + $0x88] sm:$0xff] }
   0x9   :  { %158 = vmatpush.msra.mxu3 %v76_v10  ;;  %117 = vmatpush.msra.mxu1 %v77_v18  ;;  %v73_v24 = vld [vmem:[%s707_s1 + $0x150] sm:$0xff]  ;;  %v47_v25 = vld [vmem:[%s707_s1 + $0x80] sm:$0xff]  ;;  %v68_v26 = vld [vmem:[%s707_s1 + $0x128] sm:$0xff] }
   0xa   :  { %133 = vmatpush.msra.mxu2 %v54_v11  ;;  %93 = vmatpush.msra.mxu0 %v53_v12  ;;  %v30_v27 = vld [vmem:[%s706_s0] sm:$0xf]  ;;  %v46_v28 = vld [vmem:[%s707_s1 + $0x78] sm:$0xff]  ;;  %v45_v30 = vld [vmem:[%s707_s1 + $0x70] sm:$0xff] }
   0xb   :  { %159 = vmatpush.msra.mxu3 %v74_v13  ;;  %118 = vmatpush.msra.mxu1 %v75_v22  ;;  %82 = vst [vmem:[#allocation1] ss:$4 sm:$0xff] %v30_v27  ;;  %v71_v29 = vld [vmem:[%s707_s1 + $0x140] sm:$0xff]  ;;  %v66_v31 = vld [vmem:[%s707_s1 + $0x118] sm:$0xff]  ;;  %v44_v32 = vld [vmem:[%s707_s1 + $0x68] sm:$0xff] }
   0xc   :  { %134 = vmatpush.msra.mxu2 %v52_v14  ;;  %94 = vmatpush.msra.mxu0 %v51_v16  ;;  %v69_v33 = vld [vmem:[%s707_s1 + $0x130] sm:$0xff]  ;;  %v43_v34 = vld [vmem:[%s707_s1 + $0x60] sm:$0xff]  ;;  %v64_v35 = vld [vmem:[%s707_s1 + $0x108] sm:$0xff] }
   0xd   :  { %160 = vmatpush.msra.mxu3 %v72_v17  ;;  %119 = vmatpush.msra.mxu1 %v73_v24  ;;  %v42_v36 = vld [vmem:[%s707_s1 + $0x58] sm:$0xff]  ;;  %v67_v37 = vld [vmem:[%s707_s1 + $0x120] sm:$0xff]  ;;  %v41_v38 = vld [vmem:[%s707_s1 + $0x50] sm:$0xff] }
   0xe   :  { %135 = vmatpush.msra.mxu2 %v50_v19  ;;  %95 = vmatpush.msra.mxu0 %v49_v20  ;;  %v40_v39 = vld [vmem:[%s707_s1 + $0x48] sm:$0xff]  ;;  %v38_v40 = vld [vmem:[%s707_s1 + $0x38] sm:$0xff]  ;;  %v65_v41 = vld [vmem:[%s707_s1 + $0x110] sm:$0xff] }
   0xf   :  { %161 = vmatpush.msra.mxu3 %v70_v21  ;;  %120 = vmatpush.msra.mxu1 %v71_v29  ;;  %v39_v43 = vld [vmem:[%s707_s1 + $0x40] sm:$0xff]  ;;  %v37_v46 = vld [vmem:[%s707_s1 + $0x30] sm:$0xff] }
  0x10   :  { %136 = vmatpush.msra.mxu2 %v48_v23  ;;  %96 = vmatpush.msra.mxu0 %v47_v25  ;;  %v211_v44 = vld [vmem:[%s710_s4 + $0xc0] sm:$0x3f] }
  0x11   :  { %162 = vmatpush.msra.mxu3 %v68_v26  ;;  %121 = vmatpush.msra.mxu1 %v69_v33  ;;  %v63_v45 = vld [vmem:[%s707_s1 + $0x100] sm:$0xff] }
  0x12   :  { %137 = vmatpush.msra.mxu2 %v46_v28  ;;  %97 = vmatpush.msra.mxu0 %v45_v30  ;;  %v84_v42 = vld.sshfl [vmem:[#allocation1 + $0x8] sm:$0xff pattern:$0x73625140] }
  0x13   :  { %163 = vmatpush.msra.mxu3 %v66_v31  ;;  %122 = vmatpush.msra.mxu1 %v67_v37 }
  0x14   :  { %138 = vmatpush.msra.mxu2 %v44_v32  ;;  %98 = vmatpush.msra.mxu0 %v43_v34 }
  0x15   :  { %164 = vmatpush.msra.mxu3 %v64_v35  ;;  %123 = vmatpush.msra.mxu1 %v65_v41 }
  0x16   :  { %139 = vmatpush.msra.mxu2 %v42_v36  ;;  %99 = vmatpush.msra.mxu0 %v41_v38 }
  0x17   :  { %336 = vmatmul.msk.f32.vlgmr.msra.gmra.mxu3 %vm86_vm0, %v84_v42 }
  0x18   :  { %140 = vmatpush.msra.mxu2 %v40_v39 }
  0x19   :  { %13 = vsyncpa [#allocation3], 0  ;;  %v36_v47 = vld [vmem:[%s707_s1 + $0x28] sm:$0xff]  ;;  %100 = vmatpush.msra.mxu0 %v39_v43  ;;  %v202_v48 = vld [vmem:[%s710_s4 + $0x78] sm:$0xff]  ;;  %337 = vmatpush.msk.msrb.mxu3 %vm220_vm1, %v211_v44  ;;  %vm216_vm2 = vcmask 572416   ;;  %vm281_vm3 = vcmask 785408  }
  0x1a   :  { %141 = vmatpush.msra.mxu2 %v38_v40  ;;  %v35_v49 = vld [vmem:[%s707_s1 + $0x20] sm:$0xff]  ;;  %124 = vmatpush.msra.mxu1 %v63_v45  ;;  %v210_v50 = vld [vmem:[%s710_s4 + $0xb8] sm:$0xff]  ;;  %v201_v52 = vld [vmem:[%s710_s4 + $0x70] sm:$0xff]  ;;  %vm305_vm4 = vcmask 17408   ;;  %s326_s0 = sshll.u32 %s714_s8, 4  ;;  %s327_s0 = int_to_ptr.hbm [resolvable:$true] %s326_s0 }
  0x1b   :  { %v34_v51 = vld [vmem:[%s707_s1 + $0x18] sm:$0xff]  ;;  %101 = vmatpush.msra.mxu0 %v37_v46  ;;  %335 = vmatmul.msk.f32.vlgmr.msra.gmra.mxu1 %vm86_vm0, %v84_v42  ;;  %v33_v53 = vld [vmem:[%s707_s1 + $0x10] sm:$0xff]  ;;  %v32_v55 = vld [vmem:[%s707_s1 + $0x8] sm:$0xff] }
  0x1c   :  { %142 = vmatpush.msra.mxu2 %v36_v47  ;;  %224 = vmatpush.msrb.mxu1 %v202_v48  ;;  %v209_v54 = vld [vmem:[%s710_s4 + $0xb0] sm:$0xff]  ;;  %v200_v56 = vld [vmem:[%s710_s4 + $0x68] sm:$0xff]  ;;  %v83_v57 = vld.sshfl [vmem:[#allocation1] sm:$0xff pattern:$0x73625140] }
  0x1d   :  { %102 = vmatpush.msra.mxu0 %v35_v49  ;;  %252 = vmatpush.msrb.mxu3 %v210_v50  ;;  %v31_v58 = vld [vmem:[%s707_s1] sm:$0xff]  ;;  %v208_v60 = vld [vmem:[%s710_s4 + $0xa8] sm:$0xff]  ;;  %v198_v61 = vld [vmem:[%s710_s4 + $0x58] sm:$0xff] }
  0x1e   :  { %143 = vmatpush.msra.mxu2 %v34_v51  ;;  %225 = vmatpush.msrb.mxu1 %v201_v52  ;;  %v199_v59 = vld [vmem:[%s710_s4 + $0x60] sm:$0xff]  ;;  %v197_v62 = vld [vmem:[%s710_s4 + $0x50] sm:$0xff]  ;;  %v196_v63 = vld [vmem:[%s710_s4 + $0x48] sm:$0xff] }
  0x1f   :  { %103 = vmatpush.msra.mxu0 %v33_v53  ;;  %253 = vmatpush.msrb.mxu3 %v209_v54  ;;  %v195_v0 = vld [vmem:[%s710_s4 + $0x40] sm:$0xff]  ;;  %v194_v1 = vld [vmem:[%s710_s4 + $0x38] sm:$0xff]  ;;  %v193_v2 = vld [vmem:[%s710_s4 + $0x30] sm:$0xff] }
  0x20   :  { %144 = vmatpush.msra.mxu2 %v32_v55  ;;  %226 = vmatpush.msrb.mxu1 %v200_v56  ;;  %v207_v3 = vld [vmem:[%s710_s4 + $0xa0] sm:$0xff]  ;;  %v192_v4 = vld [vmem:[%s710_s4 + $0x28] sm:$0xff]  ;;  %v206_v5 = vld [vmem:[%s710_s4 + $0x98] sm:$0xff] }
  0x21   :  { %145 = vmatmul.f32.vlgmr.msra.gmra.mxu2 %v83_v57  ;;  %104 = vmatpush.msra.mxu0 %v31_v58  ;;  %v191_v6 = vld [vmem:[%s710_s4 + $0x20] sm:$0xff]  ;;  %v205_v7 = vld [vmem:[%s710_s4 + $0x90] sm:$0xff]  ;;  %v190_v8 = vld [vmem:[%s710_s4 + $0x18] sm:$0xff] }
  0x22   :  { %105 = vmatmul.f32.vlgmr.msra.gmra.mxu0 %v83_v57  ;;  %227 = vmatpush.msrb.mxu1 %v199_v59  ;;  %v204_v9 = vld [vmem:[%s710_s4 + $0x88] sm:$0xff]  ;;  %v189_v10 = vld [vmem:[%s710_s4 + $0x10] sm:$0xff]  ;;  %v203_v11 = vld [vmem:[%s710_s4 + $0x80] sm:$0xff] }
  0x23   :  { %254 = vmatpush.msrb.mxu3 %v208_v60  ;;  %v188_v12 = vld [vmem:[%s710_s4 + $0x8] sm:$0xff]  ;;  %v187_v13 = vld [vmem:[%s710_s4] sm:$0xff]  ;;  %v276_v14 = vld [vmem:[%s712_s6 + $0x58] sm:$0xff] }
  0x24   :  { %228 = vmatpush.msrb.mxu1 %v198_v61  ;;  %289 = vmatpush.msrb.mxu0 %v276_v14  ;;  %v275_v15 = vld [vmem:[%s712_s6 + $0x50] sm:$0xff]  ;;  %v274_v16 = vld [vmem:[%s712_s6 + $0x48] sm:$0xff]  ;;  %v273_v17 = vld [vmem:[%s712_s6 + $0x40] sm:$0xff] }
  0x25   :  { %255 = vmatpush.msrb.mxu3 %v207_v3  ;;  %v272_v18 = vld [vmem:[%s712_s6 + $0x38] sm:$0xff]  ;;  %v271_v19 = vld [vmem:[%s712_s6 + $0x30] sm:$0xff]  ;;  %v169_v20 = vld [vmem:[%s708_s2] sm:$0x3] }
  0x26   :  { %229 = vmatpush.msrb.mxu1 %v197_v62  ;;  %290 = vmatpush.msrb.mxu0 %v275_v15  ;;  %v171_v22 = vperm.slane %v169_v20, 0  ;;  %v177_v23 = vld [vmem:[%s709_s3] sm:$0x3]  ;;  %v172_v29 = vperm.slane %v169_v20, 1  ;;  %v270_v38 = vld [vmem:[%s712_s6 + $0x28] sm:$0xff]  ;;  %v268_v40 = vld [vmem:[%s712_s6 + $0x18] sm:$0xff] }
  0x27   :  { %256 = vmatpush.msrb.mxu3 %v206_v5  ;;  %v179_v26 = vperm.slane %v177_v23, 0  ;;  %v180_v33 = vperm.slane %v177_v23, 1  ;;  %v269_v39 = vld [vmem:[%s712_s6 + $0x20] sm:$0xff]  ;;  %v267_v41 = vld [vmem:[%s712_s6 + $0x10] sm:$0xff]  ;;  %v266_v42 = vld [vmem:[%s712_s6 + $0x8] sm:$0xff] }
  0x28   :  { %230 = vmatpush.msrb.mxu1 %v196_v63  ;;  %291 = vmatpush.msrb.mxu0 %v274_v16  ;;  %v265_v43 = vld [vmem:[%s712_s6] sm:$0xff] }
  0x29   :  { %257 = vmatpush.msrb.mxu3 %v205_v7  ;;  %v341_v44 = vld [vmem:[%s711_s5] ss:$0 sm:$0xff]  ;;  %s375_s5 = smov [#allocation2]  }
  0x2a   :  { %231 = vmatpush.msrb.mxu1 %v195_v0  ;;  %292 = vmatpush.msrb.mxu0 %v273_v17  ;;  %v342_v50 = vld [vmem:[%s713_s7] ss:$0 sm:$0xff]  ;;  %s324_s6 = sshll.u32 %s375_s5, 4  ;;  %s325_s6 = int_to_ptr.vmem [resolvable:$true] %s324_s6 }
  0x2b   :  { %258 = vmatpush.msrb.mxu3 %v204_v9 }
  0x2c   :  { %232 = vmatpush.msrb.mxu1 %v194_v1  ;;  %293 = vmatpush.msrb.mxu0 %v272_v18 }
  0x2d   :  { %259 = vmatpush.msrb.mxu3 %v203_v11 }
  0x2e   :  { %233 = vmatpush.msrb.mxu1 %v193_v2  ;;  %294 = vmatpush.msrb.mxu0 %v271_v19 }
  0x30   :  { %234 = vmatpush.msrb.mxu1 %v192_v4  ;;  %295 = vmatpush.msrb.mxu0 %v270_v38 }
  0x32   :  { %235 = vmatpush.msrb.mxu1 %v191_v6  ;;  %296 = vmatpush.msrb.mxu0 %v269_v39 }
  0x34   :  { %236 = vmatpush.msrb.mxu1 %v190_v8  ;;  %297 = vmatpush.msrb.mxu0 %v268_v40 }
  0x36   :  { %237 = vmatpush.msrb.mxu1 %v189_v10  ;;  %298 = vmatpush.msrb.mxu0 %v267_v41 }
  0x38   :  { %238 = vmatpush.msrb.mxu1 %v188_v12  ;;  %299 = vmatpush.msrb.mxu0 %v266_v42 }
  0x3a   :  { %239 = vmatpush.msrb.mxu1 %v187_v13  ;;  %300 = vmatpush.msrb.mxu0 %v265_v43 }
  0x98   :  { %v126_v21 = vpop.f32.mrf.mxu1 }
  0x9a   :  { %v166_v27 = vpop.f32.mrf.mxu3 }
  0x9f   :  { %v106_v24 = vpop.f32.mrf.mxu0 }
  0xa0   :  { %v127_v25 = vadd.f32 %v126_v21, %v106_v24 }
  0xa2   :  { %v175_v28 = vmul.f32 %v171_v22, %v127_v25 }
  0xa4   :  { %v146_v30 = vpop.f32.mrf.mxu2  ;;  %v183_v31 = vadd.f32 %v179_v26, %v175_v28 }
  0xa5   :  { %v167_v32 = vadd.f32 %v166_v27, %v146_v30 }
  0xa6   :  { %v185_v34 = vmax.f32 %v183_v31, 0.0 }
  0xa7   :  { %v176_v35 = vmul.f32 %v172_v29, %v167_v32 }
  0xa8   :  { %240 = vmatmul.f32.vlgmr.msrb.gmra.mxu1 %v185_v34 }
  0xa9   :  { %v184_v36 = vadd.f32 %v180_v33, %v176_v35 }
  0xab   :  { %v186_v37 = vmax.f32 %v184_v36, 0.0 }
  0xad   :  { %338 = vmatmul.msk.f32.vlgmr.msrb.gmra.mxu3 %vm216_vm2, %v186_v37 }
 0x125   :  { %v241_v45 = vpop.f32.mrf.mxu1 }
 0x126   :  { %v242_v46 = vadd.f32 %v341_v44, %v241_v45 }
 0x130   :  { %v261_v47 = vpop.f32.mrf.mxu3 }
 0x131   :  { %v262_v48 = vadd.f32 %v261_v47, %v242_v46 }
 0x133   :  { %343 = vtanh.f32 %v262_v48 }
 0x139   :  { %v344_v49 = vpop.eup %343 }
 0x13a   :  { %339 = vmatmul.msk.f32.vlgmr.msrb.gmra.mxu0 %vm281_vm3, %v344_v49 }
 0x1b7   :  { %v302_v51 = vpop.f32.mrf.mxu0 }
 0x1b8   :  { %v303_v52 = vadd.f32 %v342_v50, %v302_v51 }
 0x1ba   :  { %v306_v53 = vsel %vm305_vm4, %v303_v52, -inf }
 0x1bb   :  { %307 = vmax.xlane.f32.xlu0 %v306_v53 }
 0x22e   :  { %v308_v54 = vpop.xlane.xlu0 %307 }
 0x22f   :  { %v309_v55 = vsub.f32 %v303_v52, %v308_v54 }
 0x231   :  { %v310_v56 = vmul.f32 1.442695, %v309_v55 }
 0x233   :  { %345 = vpow2.f32 %v310_v56 }
 0x239   :  { %v346_v57 = vpop.eup %345 }
 0x23a   :  { %v312_v58 = vsel %vm305_vm4, %v346_v57, 0.0 }
 0x23b   :  { %313 = vadd.xlane.f32.xlu0 %v312_v58 }
 0x2ae   :  { %v314_v59 = vpop.xlane.xlu0 %313 }
 0x2af   :  { %347 = vlog2.f32 %v314_v59 }
 0x2b5   :  { %v348_v60 = vpop.eup %347 }
 0x2b6   :  { %v316_v61 = vmul.f32 0.6931472, %v348_v60 }
 0x2b8   :  { %v317_v62 = vsub.f32 %v309_v55, %v316_v61 }
 0x2ba   :  { %318 = vst.msk [vmem:[#allocation2] sm:$0x3] %vm305_vm4, %v317_v62 }
 0x2bb   :  { %329 = dma.vmem_to_hbm [thread:$0]  %s325_s6, 32, %s327_s0, [#allocation3]  }
 0x2bc   :  { %373 = dma.done.wait [#allocation3], 32  }
 0x2bd   :  { %374 = vsyncadd [#allocation3], 4294967264 }
 0x2be   :  { %334 = vsyncpa [#allocation3], 1 }

</bundles_post_ra>
